<compile_context>
chip_gen: v5e
topology: v5e:2x2
jax: 0.10.0
libtpu: 0.0.40
codegen_flags: <defaults>
</compile_context>

<pallas_src>
import jax
import jax.numpy as jnp
from jax import lax
from jax.experimental import pallas as pl
from jax.experimental.pallas import tpu as pltpu

EPS = 1e-5      # nn.InstanceNorm2d default
_EXT = 128      # lane-aligned halo for the +/-1 column shifts


def _round_up(x, m):
    return (x + m - 1) // m * m


def _vmem_capacity_bytes():
    try:
        info = pltpu.get_tpu_info()
        cap = getattr(info, "vmem_capacity_bytes", None)
        if cap:
            return int(cap)
    except Exception:
        pass
    return 64 * 1024 * 1024   # conservative fallback (v7x per-TC VMEM)


# ----------------------------------------------------------------------------- #
# Shared conv body: 3x3 conv contribution for one row-aligned spatial tile.
# ----------------------------------------------------------------------------- #
def _conv3x3_acc(xu_ref, xm_ref, xd_ref, w_ref, mask_ref):
    # xu/xm/xd : (1, Cin_p, T)  row-shifted inputs (source rows h-1 / h / h+1)
    # w_ref    : (KW, Cout, KH*Cin_p)  weight, (kh, cin)-minor per kw group
    # mask_ref : (2, T)  column-validity masks for kw=0 / kw=2 (input dtype)
    # returns  : f32 (Cout, T)
    T = xm_ref.shape[2]
    # Stack the three row taps on sublanes once: rows ordered (kh=0, kh=1, kh=2).
    X = jnp.concatenate([xu_ref[0], xm_ref[0], xd_ref[0]], axis=0)    # (3*Cin_p, T)
    # Hoisted +/-1 column shifts: one lane-aligned zero extension, two shifted
    # slices, two mask multiplies.  Masks kill source columns outside [0, W).
    zpad = jnp.zeros((X.shape[0], _EXT), dtype=X.dtype)
    Xe = jnp.concatenate([zpad, X, zpad], axis=1)                     # (3*Cin_p, T+2*_EXT)
    Xl = Xe[:, _EXT - 1:_EXT - 1 + T] * mask_ref[0:1, :]              # source col w-1 (kw=0)
    Xr = Xe[:, _EXT + 1:_EXT + 1 + T] * mask_ref[1:2, :]              # source col w+1 (kw=2)
    # Three accumulating MXU pushes with K = 3*Cin_p, f32 accumulation.
    acc = jnp.dot(w_ref[0], Xl, preferred_element_type=jnp.float32)
    acc = acc + jnp.dot(w_ref[1], X, preferred_element_type=jnp.float32)
    acc = acc + jnp.dot(w_ref[2], Xr, preferred_element_type=jnp.float32)
    return acc


# ----------------------------------------------------------------------------- #
# Path A (fused): conv + InstanceNorm (two-pass, f32) + folded affine + ReLU.
# ----------------------------------------------------------------------------- #
def fused_kernel(xu_ref, xm_ref, xd_ref, w_ref, b_ref, g_ref, beta_ref, mask_ref,
                 o_ref):
    acc = _conv3x3_acc(xu_ref, xm_ref, xd_ref, w_ref, mask_ref)
    acc = acc + b_ref[...]                                   # (Cout, HW) + (Cout, 1)
    inv_hw = 1.0 / acc.shape[1]
    mean = jnp.sum(acc, axis=1, keepdims=True) * inv_hw
    centered = acc - mean
    var = jnp.sum(centered * centered, axis=1, keepdims=True) * inv_hw
    scale = g_ref[...] * lax.rsqrt(var + EPS)                # folded affine
    out = jnp.maximum(centered * scale + beta_ref[...], 0.0)
    o_ref[0] = out.astype(o_ref.dtype)


# ----------------------------------------------------------------------------- #
# Path B (tiled, pass 1): conv + bias + per-tile per-channel sum / sumsq.
# ----------------------------------------------------------------------------- #
def conv_stats_kernel(xu_ref, xm_ref, xd_ref, w_ref, b_ref, mask_ref,
                      y_ref, sum_ref, sq_ref):
    acc = _conv3x3_acc(xu_ref, xm_ref, xd_ref, w_ref, mask_ref)
    acc = acc + b_ref[...]
    y_ref[0] = acc.astype(y_ref.dtype)
    sum_ref[0, 0] = jnp.sum(acc, axis=1, keepdims=True)      # (Cout, 1) f32
    sq_ref[0, 0] = jnp.sum(acc * acc, axis=1, keepdims=True)


# ----------------------------------------------------------------------------- #
# Path B (tiled, pass 2): normalize (folded affine) + ReLU, lane-dense sweep.
# ----------------------------------------------------------------------------- #
def norm_relu_kernel(y_ref, scale_ref, shift_ref, o_ref):
    y = y_ref[0].astype(jnp.float32)                         # (Cout, T)
    out = jnp.maximum(y * scale_ref[0] + shift_ref[0], 0.0)
    o_ref[0] = out.astype(o_ref.dtype)


# ----------------------------------------------------------------------------- #
# Wrapper
# ----------------------------------------------------------------------------- #
def same_block2d(x_nchw, weight_oihw, bias, gamma, beta, *, tile_rows=None):
    """x_nchw: (B, Cin, H, W).  Returns (B, Cout, H, W); matches PyTorch semantics."""
    B, Cin, H, W = x_nchw.shape
    Cout, Cin_w, KH, KW = weight_oihw.shape
    assert Cin_w == Cin and KH == 3 and KW == 3, "SameBlock2d default: 3x3, groups=1"
    HW = H * W
    dt = x_nchw.dtype
    isz = x_nchw.dtype.itemsize
    sub = 8 if isz >= 4 else (16 if isz == 2 else 32)
    Cin_p = _round_up(Cin, sub)                # pad channels to the sublane tile

    # ---- inputs: flatten spatial, pad channels, build row-shifted copies ------
    x_flat = x_nchw.reshape(B, Cin, HW)
    if Cin_p != Cin:
        x_flat = jnp.pad(x_flat, ((0, 0), (0, Cin_p - Cin), (0, 0)))
    zrow = jnp.zeros((B, Cin_p, W), dtype=dt)
    x_up = jnp.concatenate([zrow, x_flat[:, :, :-W]], axis=2)   # kh=0 -> row h-1
    x_dn = jnp.concatenate([x_flat[:, :, W:], zrow], axis=2)    # kh=2 -> row h+1

    # ---- weights: (Cout, Cin, KH, KW) -> (KW, Cout, KH*Cin_p), (kh, cin)-minor --
    w = jnp.transpose(weight_oihw, (3, 0, 2, 1))                # (KW, Cout, KH, Cin)
    if Cin_p != Cin:
        w = jnp.pad(w, ((0, 0), (0, 0), (0, 0), (0, Cin_p - Cin)))
    w = w.reshape(KW, Cout, KH * Cin_p).astype(dt)

    b2 = bias.reshape(Cout, 1).astype(jnp.float32)
    g2 = gamma.reshape(Cout, 1).astype(jnp.float32)
    bt2 = beta.reshape(Cout, 1).astype(jnp.float32)

    # ---- path / tile selection (generation-aware VMEM budget) -----------------
    cap = _vmem_capacity_bytes()
    vmem_limit = max(32 * 2**20, min(int(0.55 * cap), 96 * 2**20))
    budget = int(0.8 * vmem_limit)

    def footprint(thw):
        # double-buffered inputs + stacked/extended/shifted temps + f32 acc + out
        return ((6 + 13) * Cin_p * thw * isz
                + 3 * Cout * thw * 4
                + 2 * Cout * thw * isz)

    if tile_rows is not None:
        assert H % tile_rows == 0 and (tile_rows * W) % 128 == 0, "bad tile_rows"
        use_fused = tile_rows >= H
        tile_hw = tile_rows * W
    elif footprint(HW) <= budget:
        use_fused, tile_hw = True, HW
    else:
        cands = [r for r in range(1, H) if H % r == 0 and (r * W) % 128 == 0]
        fit = [r for r in cands if footprint(r * W) <= budget]
        if fit:
            use_fused, tile_hw = False, max(fit) * W
        elif cands:
            use_fused, tile_hw = False, min(cands) * W
        else:
            # TODO(synk): no clean row tiling exists; fall back to the fused kernel
            # (a manual-DMA halo path would remove this VMEM cliff for huge maps).
            use_fused, tile_hw = True, HW
    if use_fused:
        tile_hw = HW

    # ---- column-validity masks (tiles start at row boundaries, so p % W = col) -
    col = jnp.arange(tile_hw, dtype=jnp.int32) % W
    mask = jnp.stack([(col >= 1), (col <= W - 2)], axis=0).astype(dt)   # (2, T)

    cparams = pltpu.CompilerParams
    # ------------------------------ fused path ---------------------------------
    if use_fused:
        out_flat = pl.pallas_call(
            fused_kernel,
            out_shape=jax.ShapeDtypeStruct((B, Cout, HW), dt),
            grid_spec=pltpu.PrefetchScalarGridSpec(
                num_scalar_prefetch=0,
                grid=(B,),
                in_specs=[
                    pl.BlockSpec((1, Cin_p, HW), lambda b: (b, 0, 0)),
                    pl.BlockSpec((1, Cin_p, HW), lambda b: (b, 0, 0)),
                    pl.BlockSpec((1, Cin_p, HW), lambda b: (b, 0, 0)),
                    pl.BlockSpec((KW, Cout, KH * Cin_p), lambda b: (0, 0, 0)),
                    pl.BlockSpec((Cout, 1), lambda b: (0, 0)),
                    pl.BlockSpec((Cout, 1), lambda b: (0, 0)),
                    pl.BlockSpec((Cout, 1), lambda b: (0, 0)),
                    pl.BlockSpec((2, HW), lambda b: (0, 0)),
                ],
                out_specs=pl.BlockSpec((1, Cout, HW), lambda b: (b, 0, 0)),
            ),
            compiler_params=cparams(dimension_semantics=("parallel",),
                                    vmem_limit_bytes=vmem_limit),
        )(x_up, x_flat, x_dn, w, b2, g2, bt2, mask)
        return out_flat.reshape(B, Cout, H, W)

    # ------------------------------ tiled path ---------------------------------
    NT = HW // tile_hw

    conv_out, tsum, tsq = pl.pallas_call(
        conv_stats_kernel,
        out_shape=(jax.ShapeDtypeStruct((B, Cout, HW), dt),
                   jax.ShapeDtypeStruct((B, NT, Cout, 1), jnp.float32),
                   jax.ShapeDtypeStruct((B, NT, Cout, 1), jnp.float32)),
        grid_spec=pltpu.PrefetchScalarGridSpec(
            num_scalar_prefetch=0,
            grid=(B, NT),
            in_specs=[
                pl.BlockSpec((1, Cin_p, tile_hw), lambda b, t: (b, 0, t)),
                pl.BlockSpec((1, Cin_p, tile_hw), lambda b, t: (b, 0, t)),
                pl.BlockSpec((1, Cin_p, tile_hw), lambda b, t: (b, 0, t)),
                pl.BlockSpec((KW, Cout, KH * Cin_p), lambda b, t: (0, 0, 0)),
                pl.BlockSpec((Cout, 1), lambda b, t: (0, 0)),
                pl.BlockSpec((2, tile_hw), lambda b, t: (0, 0)),
            ],
            out_specs=[
                pl.BlockSpec((1, Cout, tile_hw), lambda b, t: (b, 0, t)),
                pl.BlockSpec((1, 1, Cout, 1), lambda b, t: (b, t, 0, 0)),
                pl.BlockSpec((1, 1, Cout, 1), lambda b, t: (b, t, 0, 0)),
            ],
        ),
        compiler_params=cparams(dimension_semantics=("parallel", "parallel"),
                                vmem_limit_bytes=vmem_limit),
    )(x_up, x_flat, x_dn, w, b2, mask)

    # Tiny per-(b, channel) stats reduction + affine fold in plain JAX (f32).
    # TODO(synk): E[x^2]-mean^2 can cancel for very large-mean activations.
    mean = jnp.sum(tsum, axis=1)[..., 0] / HW                       # (B, Cout)
    ex2 = jnp.sum(tsq, axis=1)[..., 0] / HW
    var = jnp.maximum(ex2 - mean * mean, 0.0)
    scale = gamma.astype(jnp.float32)[None, :] * lax.rsqrt(var + EPS)
    shift = beta.astype(jnp.float32)[None, :] - mean * scale
    scale = scale[..., None]                                        # (B, Cout, 1)
    shift = shift[..., None]

    out_flat = pl.pallas_call(
        norm_relu_kernel,
        out_shape=jax.ShapeDtypeStruct((B, Cout, HW), dt),
        grid_spec=pltpu.PrefetchScalarGridSpec(
            num_scalar_prefetch=0,
            grid=(B, NT),
            in_specs=[
                pl.BlockSpec((1, Cout, tile_hw), lambda b, t: (b, 0, t)),
                pl.BlockSpec((1, Cout, 1), lambda b, t: (b, 0, 0)),
                pl.BlockSpec((1, Cout, 1), lambda b, t: (b, 0, 0)),
            ],
            out_specs=pl.BlockSpec((1, Cout, tile_hw), lambda b, t: (b, 0, t)),
        ),
        compiler_params=cparams(dimension_semantics=("parallel", "parallel"),
                                vmem_limit_bytes=vmem_limit),
    )(conv_out, scale, shift)

    return out_flat.reshape(B, Cout, H, W)


# ----------------------------------------------------------------------------- #
# Plain-JAX reference (mirrors Conv2d + InstanceNorm2d(affine) + ReLU)
# ----------------------------------------------------------------------------- #
def _reference(x_nchw, weight_oihw, bias, gamma, beta):
    out = lax.conv_general_dilated(
        x_nchw, weight_oihw, window_strides=(1, 1), padding=((1, 1), (1, 1)),
        dimension_numbers=("NCHW", "OIHW", "NCHW"))
    out = out + bias.reshape(1, -1, 1, 1)
    mean = jnp.mean(out, axis=(2, 3), keepdims=True)
    var = jnp.mean((out - mean) ** 2, axis=(2, 3), keepdims=True)
    out = (out - mean) * lax.rsqrt(var + EPS)
    out = out * gamma.reshape(1, -1, 1, 1) + beta.reshape(1, -1, 1, 1)
    return jnp.maximum(out, 0.0)


if __name__ == "__main__":
    B, Cin, Cout, H, W = 2, 4, 8, 16, 16
    key = jax.random.PRNGKey(0)
    kx, kw_key, kb, kg, kbt = jax.random.split(key, 5)

    x = jax.random.normal(kx, (B, Cin, H, W), dtype=jnp.float32)
    weight = jax.random.normal(kw_key, (Cout, Cin, 3, 3), dtype=jnp.float32) * 0.1
    bias = jax.random.normal(kb, (Cout,), dtype=jnp.float32) * 0.1
    gamma = 1.0 + 0.1 * jax.random.normal(kg, (Cout,), dtype=jnp.float32)
    beta = 0.1 * jax.random.normal(kbt, (Cout,), dtype=jnp.float32)

    ref = _reference(x, weight, bias, gamma, beta)

    # Fused path (small maps: whole image per grid step).
    out_fused = jax.block_until_ready(same_block2d(x, weight, bias, gamma, beta))
    assert out_fused.shape == (B, Cout, H, W)
    assert jnp.allclose(out_fused, ref, atol=1e-4, rtol=1e-4), "fused path mismatch"

    # Spatially tiled two-pass path (forced here; auto-selected for large maps).
    out_tiled = jax.block_until_ready(
        same_block2d(x, weight, bias, gamma, beta, tile_rows=8))
    assert out_tiled.shape == (B, Cout, H, W)
    assert jnp.allclose(out_tiled, ref, atol=1e-4, rtol=1e-4), "tiled path mismatch"

    print("KERNEL_OK")
</pallas_src>

<mosaic_0001>
module attributes {stable_mosaic.version = 11 : i64} {
  func.func @fused_kernel(%arg0: i32, %arg1: memref<1x8x256xf32, #tpu.memory_space<vmem>>, %arg2: memref<1x8x256xf32, #tpu.memory_space<vmem>>, %arg3: memref<1x8x256xf32, #tpu.memory_space<vmem>>, %arg4: memref<3x8x24xf32, #tpu.memory_space<vmem>>, %arg5: memref<8x1xf32, #tpu.memory_space<vmem>>, %arg6: memref<8x1xf32, #tpu.memory_space<vmem>>, %arg7: memref<8x1xf32, #tpu.memory_space<vmem>>, %arg8: memref<2x256xf32, #tpu.memory_space<vmem>>, %arg9: memref<1x8x256xf32, #tpu.memory_space<vmem>>) attributes {dimension_semantics = [#tpu.dimension_semantics<parallel>], iteration_bounds = array<i64: 2>, scalar_prefetch = 0 : i64, scratch_operands = 0 : i64, tpu.core_type = #tpu.core_type<tc>, window_params = [{transform_indices = @transform_0, window_bounds = array<i64: 1, 8, 256>}, {transform_indices = @transform_1, window_bounds = array<i64: 1, 8, 256>}, {transform_indices = @transform_2, window_bounds = array<i64: 1, 8, 256>}, {pipeline_mode = #tpu.pipeline_mode<synchronous>, transform_indices = @transform_3, window_bounds = array<i64: 3, 8, 24>}, {pipeline_mode = #tpu.pipeline_mode<synchronous>, transform_indices = @transform_4, window_bounds = array<i64: 8, 1>}, {pipeline_mode = #tpu.pipeline_mode<synchronous>, transform_indices = @transform_5, window_bounds = array<i64: 8, 1>}, {pipeline_mode = #tpu.pipeline_mode<synchronous>, transform_indices = @transform_6, window_bounds = array<i64: 8, 1>}, {pipeline_mode = #tpu.pipeline_mode<synchronous>, transform_indices = @transform_7, window_bounds = array<i64: 2, 256>}, {transform_indices = @transform_8, window_bounds = array<i64: 1, 8, 256>}]} {
    %c0 = arith.constant 0 : index
    %c0_0 = arith.constant 0 : index
    %c0_1 = arith.constant 0 : index
    %0 = vector.load %arg1[%c0, %c0_0, %c0_1] : memref<1x8x256xf32, #tpu.memory_space<vmem>>, vector<1x8x256xf32>
    %1 = vector.shape_cast %0 : vector<1x8x256xf32> to vector<8x256xf32>
    %c0_2 = arith.constant 0 : index
    %c0_3 = arith.constant 0 : index
    %c0_4 = arith.constant 0 : index
    %2 = vector.load %arg2[%c0_2, %c0_3, %c0_4] : memref<1x8x256xf32, #tpu.memory_space<vmem>>, vector<1x8x256xf32>
    %3 = vector.shape_cast %2 : vector<1x8x256xf32> to vector<8x256xf32>
    %c0_5 = arith.constant 0 : index
    %c0_6 = arith.constant 0 : index
    %c0_7 = arith.constant 0 : index
    %4 = vector.load %arg3[%c0_5, %c0_6, %c0_7] : memref<1x8x256xf32, #tpu.memory_space<vmem>>, vector<1x8x256xf32>
    %5 = vector.shape_cast %4 : vector<1x8x256xf32> to vector<8x256xf32>
    %6 = tpu.concatenate %1, %3, %5 in 0 : vector<8x256xf32>, vector<8x256xf32>, vector<8x256xf32> -> vector<24x256xf32>
    %cst = arith.constant 0.000000e+00 : f32
    %7 = vector.broadcast %cst : f32 to vector<24x128xf32>
    %8 = tpu.concatenate %7, %6, %7 in 1 : vector<24x128xf32>, vector<24x256xf32>, vector<24x128xf32> -> vector<24x512xf32>
    %9 = vector.extract_strided_slice %8 {offsets = [0, 127], sizes = [24, 256], strides = [1, 1]} : vector<24x512xf32> to vector<24x256xf32>
    %c0_8 = arith.constant 0 : index
    %c0_9 = arith.constant 0 : index
    %10 = vector.load %arg8[%c0_8, %c0_9] : memref<2x256xf32, #tpu.memory_space<vmem>>, vector<1x256xf32>
    %11 = vector.broadcast %10 : vector<1x256xf32> to vector<24x256xf32>
    %12 = arith.mulf %9, %11 : vector<24x256xf32>
    %13 = vector.extract_strided_slice %8 {offsets = [0, 129], sizes = [24, 256], strides = [1, 1]} : vector<24x512xf32> to vector<24x256xf32>
    %c1 = arith.constant 1 : index
    %c0_10 = arith.constant 0 : index
    %14 = vector.load %arg8[%c1, %c0_10] : memref<2x256xf32, #tpu.memory_space<vmem>>, vector<1x256xf32>
    %15 = vector.broadcast %14 : vector<1x256xf32> to vector<24x256xf32>
    %16 = arith.mulf %13, %15 : vector<24x256xf32>
    %c0_11 = arith.constant 0 : index
    %c0_12 = arith.constant 0 : index
    %c0_13 = arith.constant 0 : index
    %17 = vector.load %arg4[%c0_11, %c0_12, %c0_13] : memref<3x8x24xf32, #tpu.memory_space<vmem>>, vector<1x8x24xf32>
    %18 = vector.shape_cast %17 : vector<1x8x24xf32> to vector<8x24xf32>
    %cst_14 = arith.constant dense<0.000000e+00> : vector<8x256xf32>
    %19 = tpu.matmul %18, %12, %cst_14 {dimension_numbers = #tpu.dot_dimension_numbers<[1], [0], [0], [1], [0, 0, 1, 1], [], []>} : vector<8x24xf32>, vector<24x256xf32>, vector<8x256xf32> -> vector<8x256xf32>
    %c1_15 = arith.constant 1 : index
    %c0_16 = arith.constant 0 : index
    %c0_17 = arith.constant 0 : index
    %20 = vector.load %arg4[%c1_15, %c0_16, %c0_17] : memref<3x8x24xf32, #tpu.memory_space<vmem>>, vector<1x8x24xf32>
    %21 = vector.shape_cast %20 : vector<1x8x24xf32> to vector<8x24xf32>
    %cst_18 = arith.constant dense<0.000000e+00> : vector<8x256xf32>
    %22 = tpu.matmul %21, %6, %cst_18 {dimension_numbers = #tpu.dot_dimension_numbers<[1], [0], [0], [1], [0, 0, 1, 1], [], []>} : vector<8x24xf32>, vector<24x256xf32>, vector<8x256xf32> -> vector<8x256xf32>
    %23 = arith.addf %19, %22 : vector<8x256xf32>
    %c2 = arith.constant 2 : index
    %c0_19 = arith.constant 0 : index
    %c0_20 = arith.constant 0 : index
    %24 = vector.load %arg4[%c2, %c0_19, %c0_20] : memref<3x8x24xf32, #tpu.memory_space<vmem>>, vector<1x8x24xf32>
    %25 = vector.shape_cast %24 : vector<1x8x24xf32> to vector<8x24xf32>
    %cst_21 = arith.constant dense<0.000000e+00> : vector<8x256xf32>
    %26 = tpu.matmul %25, %16, %cst_21 {dimension_numbers = #tpu.dot_dimension_numbers<[1], [0], [0], [1], [0, 0, 1, 1], [], []>} : vector<8x24xf32>, vector<24x256xf32>, vector<8x256xf32> -> vector<8x256xf32>
    %27 = arith.addf %23, %26 : vector<8x256xf32>
    %c0_22 = arith.constant 0 : index
    %c0_23 = arith.constant 0 : index
    %28 = vector.load %arg5[%c0_22, %c0_23] : memref<8x1xf32, #tpu.memory_space<vmem>>, vector<8x1xf32>
    %29 = vector.broadcast %28 : vector<8x1xf32> to vector<8x256xf32>
    %30 = arith.addf %27, %29 : vector<8x256xf32>
    %cst_24 = arith.constant dense<0.000000e+00> : vector<8xf32>
    %31 = vector.multi_reduction <add>, %30, %cst_24 [1] : vector<8x256xf32> to vector<8xf32>
    %32 = vector.shape_cast %31 : vector<8xf32> to vector<8x1xf32>
    %cst_25 = arith.constant 3.906250e-03 : f32
    %33 = vector.broadcast %cst_25 : f32 to vector<8x1xf32>
    %34 = arith.mulf %32, %33 : vector<8x1xf32>
    %35 = vector.broadcast %34 : vector<8x1xf32> to vector<8x256xf32>
    %36 = arith.subf %30, %35 : vector<8x256xf32>
    %37 = arith.mulf %36, %36 : vector<8x256xf32>
    %cst_26 = arith.constant dense<0.000000e+00> : vector<8xf32>
    %38 = vector.multi_reduction <add>, %37, %cst_26 [1] : vector<8x256xf32> to vector<8xf32>
    %39 = vector.shape_cast %38 : vector<8xf32> to vector<8x1xf32>
    %cst_27 = arith.constant 3.906250e-03 : f32
    %40 = vector.broadcast %cst_27 : f32 to vector<8x1xf32>
    %41 = arith.mulf %39, %40 : vector<8x1xf32>
    %c0_28 = arith.constant 0 : index
    %c0_29 = arith.constant 0 : index
    %42 = vector.load %arg6[%c0_28, %c0_29] : memref<8x1xf32, #tpu.memory_space<vmem>>, vector<8x1xf32>
    %cst_30 = arith.constant 9.99999974E-6 : f32
    %43 = vector.broadcast %cst_30 : f32 to vector<8x1xf32>
    %44 = arith.addf %41, %43 : vector<8x1xf32>
    %45 = math.rsqrt %44 : vector<8x1xf32>
    %46 = arith.mulf %42, %45 : vector<8x1xf32>
    %47 = vector.broadcast %46 : vector<8x1xf32> to vector<8x256xf32>
    %48 = arith.mulf %36, %47 : vector<8x256xf32>
    %c0_31 = arith.constant 0 : index
    %c0_32 = arith.constant 0 : index
    %49 = vector.load %arg7[%c0_31, %c0_32] : memref<8x1xf32, #tpu.memory_space<vmem>>, vector<8x1xf32>
    %50 = vector.broadcast %49 : vector<8x1xf32> to vector<8x256xf32>
    %51 = arith.addf %48, %50 : vector<8x256xf32>
    %cst_33 = arith.constant 0.000000e+00 : f32
    %52 = vector.broadcast %cst_33 : f32 to vector<8x256xf32>
    %53 = arith.maximumf %51, %52 : vector<8x256xf32>
    %c0_34 = arith.constant 0 : index
    %c0_35 = arith.constant 0 : index
    %c0_36 = arith.constant 0 : index
    %54 = vector.load %arg9[%c0_34, %c0_35, %c0_36] : memref<1x8x256xf32, #tpu.memory_space<vmem>>, vector<1x8x256xf32>
    %55 = vector.shape_cast %54 : vector<1x8x256xf32> to vector<8x256xf32>
    %56 = vector.shape_cast %53 : vector<8x256xf32> to vector<1x8x256xf32>
    tpu.vector_store %arg9[%c0_34, %c0_35, %c0_36], %56 {strides = array<i32>} : memref<1x8x256xf32, #tpu.memory_space<vmem>>, vector<1x8x256xf32>,
    return
  }
  func.func @transform_0(%arg0: i32) -> (i32, i32, i32) {
    %c0_i32 = arith.constant 0 : i32
    %c0_i32_0 = arith.constant 0 : i32
    %c0_i32_1 = arith.constant 0 : i32
    return %arg0, %c0_i32, %c0_i32_0 : i32, i32, i32
  }
  func.func @transform_1(%arg0: i32) -> (i32, i32, i32) {
    %c0_i32 = arith.constant 0 : i32
    %c0_i32_0 = arith.constant 0 : i32
    %c0_i32_1 = arith.constant 0 : i32
    return %arg0, %c0_i32, %c0_i32_0 : i32, i32, i32
  }
  func.func @transform_2(%arg0: i32) -> (i32, i32, i32) {
    %c0_i32 = arith.constant 0 : i32
    %c0_i32_0 = arith.constant 0 : i32
    %c0_i32_1 = arith.constant 0 : i32
    return %arg0, %c0_i32, %c0_i32_0 : i32, i32, i32
  }
  func.func @transform_3(%arg0: i32) -> (i32, i32, i32) {
    %c0_i32 = arith.constant 0 : i32
    %c0_i32_0 = arith.constant 0 : i32
    %c0_i32_1 = arith.constant 0 : i32
    %c0_i32_2 = arith.constant 0 : i32
    return %c0_i32, %c0_i32_0, %c0_i32_1 : i32, i32, i32
  }
  func.func @transform_4(%arg0: i32) -> (i32, i32) {
    %c0_i32 = arith.constant 0 : i32
    %c0_i32_0 = arith.constant 0 : i32
    %c0_i32_1 = arith.constant 0 : i32
    return %c0_i32, %c0_i32_0 : i32, i32
  }
  func.func @transform_5(%arg0: i32) -> (i32, i32) {
    %c0_i32 = arith.constant 0 : i32
    %c0_i32_0 = arith.constant 0 : i32
    %c0_i32_1 = arith.constant 0 : i32
    return %c0_i32, %c0_i32_0 : i32, i32
  }
  func.func @transform_6(%arg0: i32) -> (i32, i32) {
    %c0_i32 = arith.constant 0 : i32
    %c0_i32_0 = arith.constant 0 : i32
    %c0_i32_1 = arith.constant 0 : i32
    return %c0_i32, %c0_i32_0 : i32, i32
  }
  func.func @transform_7(%arg0: i32) -> (i32, i32) {
    %c0_i32 = arith.constant 0 : i32
    %c0_i32_0 = arith.constant 0 : i32
    %c0_i32_1 = arith.constant 0 : i32
    return %c0_i32, %c0_i32_0 : i32, i32
  }
  func.func @transform_8(%arg0: i32) -> (i32, i32, i32) {
    %c0_i32 = arith.constant 0 : i32
    %c0_i32_0 = arith.constant 0 : i32
    %c0_i32_1 = arith.constant 0 : i32
    return %arg0, %c0_i32, %c0_i32_0 : i32, i32, i32
  }
}

</mosaic_0001>

<bundles_post_ra>
// kernel: tpu_custom_call.1
= control target key start
LH: loop header
LB: loop body
LE: loop exit
PB: predicated region body
PF: predicated region fallthrough
CT: control target
= control target key end

     0   :  { %s1501_s0 = inlined_call_operand.hbm [shape: f32[2,8,256], index: 0, kind: input, shape index: {}]   ;;  %s1502_s1 = inlined_call_operand.hbm [shape: f32[2,8,256], index: 1, kind: input, shape index: {}]   ;;  %s1503_s2 = inlined_call_operand.hbm [shape: f32[2,8,256], index: 2, kind: input, shape index: {}]   ;;  %s1504_s3 = inlined_call_operand.hbm [shape: f32[3,8,24], index: 3, kind: input, shape index: {}]   ;;  %s1505_s4 = inlined_call_operand.vmem [shape: f32[8,1], index: 4, kind: input, shape index: {}]   ;;  %s1506_s5 = inlined_call_operand.vmem [shape: f32[8,1], index: 5, kind: input, shape index: {}]   ;;  %s1507_s6 = inlined_call_operand.vmem [shape: f32[8,1], index: 6, kind: input, shape index: {}]   ;;  %s1508_s7 = inlined_call_operand.vmem [shape: f32[2,256], index: 7, kind: input, shape index: {}]   ;;  %s1509_s8 = inlined_call_operand.hbm [shape: f32[2,8,256], index: 8, kind: output, shape index: {}]  }
   0x1   :  { %1518 = sst [smem:[#allocation21_spill]] %s1502_s1 }
   0x2   :  { %1519 = sst [smem:[#allocation22_spill]] %s1504_s3 }
   0x3   :  { %13 = vsyncpa [#allocation3], 0 }
   0x4   :  { %15 = vsyncpa [#allocation3 + $0x1], 0 }
   0x5   :  { %16 = vsyncpa [#allocation6], 0 }
   0x6   :  { %18 = vsyncpa [#allocation6 + $0x1], 0 }
   0x7   :  { %19 = vsyncpa [#allocation9], 0 }
   0x8   :  { %20 = vsyncpa [#allocation4], 0 }
   0x9   :  { %22 = vsyncpa [#allocation4 + $0x1], 0  ;;  %s1247_s27 = smov 0   ;;  %s1249_s28 = smov 0  }
   0xa   :  { %s1251_s29 = smov 0   ;;  %s1253_s30 = smov 0  }
   0xb LB: > { %1520 = sst [smem:[#allocation15_spill]] %s1182_s27  ;;  %s1268_s9 = sadd.s32 4294967295, %s1194_s30   ;;  %s1194_s30 = sphi %s1253_s30, %s1539_s30   ;;  %s1190_s29 = sphi %s1251_s29, %s1543_s29   ;;  %s1186_s28 = sphi %s1249_s28, %s1542_s28   ;;  %s1182_s27 = sphi %s1247_s27, %s1541_s27  }
   0xc   : > { %1521 = sst [smem:[#allocation16_spill]] %s1194_s30  ;;  %s860_s10 = sadd.s32 4294967294, %s1194_s30  }
   0xd   : > { %s1272_s11 = sadd.s32 1, %s1194_s30   ;;  %s35_s12 = sadd.s32 1, %s1190_s29 }
   0xe   : > { %1522 = sst [smem:[#allocation17_spill]] %s1272_s11  ;;  %s32_s13 = ssub.s32 %s1194_s30, %s1272_s11 }
   0xf   : > { %p42_p0 = scmp.ne.s32.totalorder %s1190_s29, %s1186_s28  ;;  %p33_p1 = scmp.eq.s32.totalorder %s32_s13, 0 }
  0x10   : > { %p43_p2 = scmp.eq.s32.totalorder %s1194_s30, 0  ;;  %p48_p3 = scmp.ne.s32.totalorder %s1186_s28, %s1182_s27 }
  0x11   : > { %p229_p4 = scmp.eq.s32.totalorder %s1268_s9, 1  ;;  %p235_p7 = scmp.eq.s32.totalorder %s860_s10, 1 }
  0x12   : > { %s1284_s14 = scalar_select %p33_p1, %s1190_s29, %s35_s12  }
  0x13   : > { %p44_p5 = por %p43_p2, %p42_p0  ;;  %p1286_p6 = por %p229_p4, %p42_p0 }
  0x14   : > { %1523 = sst [smem:[#allocation18_spill]] %s1284_s14  ;;  %p926_p9 = scmp.lt.s32.totalorder %s1194_s30, 2 }
  0x15   : > { %s1524_s15 = scalar_select %p1286_p6, 1, 0 }
  0x16   : > { %p1295_p10 = por %p235_p7, %p48_p3  ;;  %s1510_s17 = sand.u32 1, %s1190_s29  }
  0x17   : > { %1525 = sst [smem:[#allocation19_spill]] %s1524_s15  ;;  %s1302_s18 = sshll.u32 %s1510_s17, 4 }
  0x18   : > { %s1526_s16 = scalar_select %p1295_p10, 1, 0 }
  0x19   : > { %s1305_s19 = sshll.u32 %s1194_s30, 4  ;;  %p1307_p11 = pnand %p926_p9, %p44_p5 }
  0x1a   : > { %1527 = sst [smem:[#allocation20_spill]] %s1526_s16  ;;  %s301_s21 = sand.u32 1, %s1194_s30  }
  0x1b   : > { %s1529_s1 = sld [smem:[#allocation21_spill]]  ;;  %s305_s26 = scalar_lea.vmem [#allocation5], %s1302_s18 }
  0x1c   : > { %s314_s10 = sshll.u32 %s305_s26, 4  ;;  %s1317_s12 = scalar_lea.sflag [#allocation6], %s301_s21  ;;  %s315_s10 = int_to_ptr.vmem [resolvable:$true] %s314_s10 }
  0x1d   : > { %p1004_p13 = pneg %p1307_p11 }
  0x21   : > { %s310_s24 = scalar_lea.hbm %s1529_s1, %s1305_s19  ;;  %s1007_s23 = scalar_lea.hbm %s1529_s1, 32 }
  0x22   : > { %s312_s25 = sshll.u32 %s310_s24, 4  ;;  %s313_s25 = int_to_ptr.hbm [resolvable:$true] %s312_s25 }
  0x23   : > { %s1000_s13 = sshra.s32 %s313_s25, 4  ;;  %s1001_s13 = int_to_ptr.hbm [resolvable:$true] %s1000_s13 }
  0x24   : > { %s1002_s17 = scalar_lea.hbm %s1001_s13, 16  ;;  %p1008_p2 = scmp.lt.s32.totalorder %s1001_s13, %s1529_s1 }
  0x25   : > { %p1003_p12 = scmp.ne.s32.totalorder %s1001_s13, %s1002_s17  ;;  %p1009_p4 = scmp.lt.s32.totalorder %s1007_s23, %s1002_s17 }
  0x27   : > { %p1005_p0 = pnand %p1004_p13, %p1003_p12  ;;  %p1010_p5 = por %p1009_p4, %p1008_p2 }
  0x29   : > { %p1006_p1 = pneg %p1005_p0 }
  0x2b   : > { %p1011_p7 = pnand %p1010_p5, %p1006_p1 }
  0x2d   : > { %1014 = shalt.err (!%p1011_p7)
}
  0x2e   : > { %917 = dma.hbm_to_vmem [thread:$0]  (!%p1307_p11), %s313_s25, 256, %s315_s10, %s1317_s12  }
  0x2f   : > { %p49_p9 = scmp.eq.s32.totalorder %s1268_s9, 0  ;;  %p861_p12 = scmp.ge.s32.totalorder %s1194_s30, 1 }
  0x30   : > { %p242_p0 = scmp.lt.s32.totalorder %s1194_s30, 3  ;;  %s1530_s3 = sld [smem:[#allocation22_spill]] }
  0x31   : > { %p1344_p1 = por %p49_p9, %p48_p3  ;;  %s1196_s25 = smov [#allocation8]  }
  0x32   : > { %p1348_p2 = pnand %p861_p12, %p242_p0  ;;  %s255_s10 = sshll.u32 %s1196_s25, 4  ;;  %s256_s10 = int_to_ptr.vmem [resolvable:$true] %s255_s10 }
  0x33   : > { %s290_s26 = scalar_lea.hbm %s1501_s0, %s1305_s19  ;;  %s285_s14 = scalar_lea.vmem [#allocation2], %s1302_s18 }
  0x34   : > { %p907_p4 = pneg %p1348_p2  ;;  %s294_s17 = sshll.u32 %s285_s14, 4  ;;  %s295_s17 = int_to_ptr.vmem [resolvable:$true] %s294_s17 }
  0x35   : > { %s292_s1 = sshll.u32 %s290_s26, 4  ;;  %s1198_s11 = smov 8   ;;  %s293_s1 = int_to_ptr.hbm [resolvable:$true] %s292_s1 }
  0x36   : > { %s253_s21 = sshll.u32 %s1530_s3, 4  ;;  %p908_p5 = pnand %p907_p4, %p49_p9  ;;  %s254_s21 = int_to_ptr.hbm [resolvable:$true] %s253_s21 }
  0x37   : > { %s1197_s3 = smov 128   ;;  %s1533_s30 = sand.u32 1, %s1190_s29  }
  0x38   : > { %910 = dma.hbm_to_vmem [thread:$0]  (!%p908_p5), %s254_s21, 384, %s256_s10, [#allocation9], %s1197_s3, %s1197_s3, %s1198_s11  }
  0x39   : > { %s282_s25 = scalar_lea.sflag [#allocation3], %s1533_s30  ;;  %s1060_s16 = sshra.s32 %s293_s1, 4  ;;  %s1061_s16 = int_to_ptr.hbm [resolvable:$true] %s1060_s16 }
  0x3a   : > { %s1062_s27 = scalar_lea.hbm %s1061_s16, 16  ;;  %s1067_s14 = scalar_lea.hbm %s1501_s0, 32 }
  0x3b   : > { %p1063_p3 = scmp.ne.s32.totalorder %s1061_s16, %s1062_s27  ;;  %p1068_p0 = scmp.lt.s32.totalorder %s1061_s16, %s1501_s0 }
  0x3c   : > { %p1069_p4 = scmp.lt.s32.totalorder %s1067_s14, %s1062_s27 }
  0x3d   : > { %p1065_p7 = pnand %p1063_p3, %p1004_p13 }
  0x3e   : > { %p1070_p5 = por %p1069_p4, %p1068_p0 }
  0x3f   : > { %p1066_p12 = pneg %p1065_p7 }
  0x41   : > { %p1071_p8 = pnand %p1070_p5, %p1066_p12 }
  0x43   : > { %1074 = shalt.err (!%p1071_p8)
}
  0x44   : > { %914 = dma.hbm_to_vmem [thread:$0]  (!%p1307_p11), %s293_s1, 256, %s295_s17, %s282_s25  }
  0x45   : > { %s330_s11 = scalar_lea.hbm %s1503_s2, %s1305_s19  ;;  %s325_s10 = scalar_lea.vmem [#allocation7], %s1302_s18 }
  0x46   : > { %s332_s21 = sshll.u32 %s330_s11, 4  ;;  %s334_s23 = sshll.u32 %s325_s10, 4  ;;  %s333_s21 = int_to_ptr.hbm [resolvable:$true] %s332_s21  ;;  %s335_s23 = int_to_ptr.vmem [resolvable:$true] %s334_s23 }
  0x47   : > { %s1090_s15 = sshra.s32 %s333_s21, 4  ;;  %s1097_s1 = scalar_lea.hbm %s1503_s2, 32  ;;  %s1091_s15 = int_to_ptr.hbm [resolvable:$true] %s1090_s15 }
  0x48   : > { %s1092_s27 = scalar_lea.hbm %s1091_s15, 16  ;;  %p1098_p12 = scmp.lt.s32.totalorder %s1091_s15, %s1503_s2 }
  0x49   : > { %p1093_p3 = scmp.ne.s32.totalorder %s1091_s15, %s1092_s27  ;;  %p1099_p0 = scmp.lt.s32.totalorder %s1097_s1, %s1092_s27 }
  0x4b   : > { %p1095_p8 = pnand %p1093_p3, %p1004_p13  ;;  %p1100_p4 = por %p1099_p0, %p1098_p12 }
  0x4d   : > { %p1096_p7 = pneg %p1095_p8 }
  0x4f   : > { %p1101_p5 = pnand %p1100_p4, %p1096_p7 }
  0x51   : > { %1104 = shalt.err (!%p1101_p5)
}
  0x52   : > { %920 = dma.hbm_to_vmem [thread:$0]  (!%p1307_p11), %s333_s21, 256, %s335_s23, %s1317_s12  }
  0x53   : > { %343 = sbr.rel (%p1348_p2) target bundleno = 884 (0x374), region = 52  ;;  %s1394_s18 = sand.u32 (!%p1348_p2), 1, %s1186_s28  }
  0x54   : > { %s1397_s19 = sshll.u32 (!%p1348_p2), %s1394_s18, 4  ;;  %s346_s14 = scalar_lea.sflag (!%p1348_p2), [#allocation3], %s1394_s18 }
  0x55   : > { %s349_s26 = scalar_lea.vmem (!%p1348_p2), [#allocation2], %s1397_s19 }
  0x58   : > { %1165 = dma.done.wait (%p1344_p1), %s346_s14, 256  }
  0x59   : > { %1167 = vsyncadd (%p1344_p1), %s346_s14, 4294967040  ;;  %s355_s20 = sand.u32 1, %s1268_s9   ;;  %s359_s22 = scalar_lea.vmem [#allocation5], %s1397_s19 }
  0x5a   : > { %s356_s12 = scalar_lea.sflag [#allocation6], %s355_s20 }
  0x5b   : > { %1169 = dma.done.wait (%p1344_p1), %s356_s12, 512  }
  0x5c   : > { %1171 = vsyncadd (%p1344_p1), %s356_s12, 4294966784  ;;  %s369_s3 = scalar_lea.vmem [#allocation7], %s1397_s19 }
  0x5d   : > { %1173 = dma.done.wait (%p49_p9), [#allocation9], 384  }
  0x5e   : > { %1175 = vsyncadd (%p49_p9), [#allocation9], 4294966912  ;;  %v879_v0 = vld [vmem:[%s1508_s7 + $0x1] ss:$2 sm:$0x3]  ;;  %s1199_s13 = smov 1  }
  0x5f   : > { %v424_v1 = vld [vmem:[%s1508_s7] ss:$2 sm:$0x3]  ;;  %v447_v2 = vperm.slane %v879_v0, 0  ;;  %s1200_s23 = smov 127   ;;  %v448_v4 = vperm.slane %v879_v0, 1 }
  0x60   : > { %v426_v3 = vperm.slane %v424_v1, 0  ;;  %v427_v5 = vperm.slane %v424_v1, 1  ;;  %v422_v6 = vld [vmem:[%s369_s3] sm:$0xff]  ;;  %v423_v7 = vld [vmem:[%s369_s3 + $0x8] sm:$0xff]  ;;  %vm432_vm0 = vcmask 1039360   ;;  %vm453_vm1 = vcmask 7168  }
  0x61   : > { %449 = vrot.lane.b32.xlu1 %v447_v2, %s1199_s13  ;;  %485 = vmatpush.msra.mxu0 %v422_v6  ;;  %v420_v8 = vld [vmem:[%s359_s22] sm:$0xff]  ;;  %v421_v9 = vld [vmem:[%s359_s22 + $0x8] sm:$0xff]  ;;  %vm468_vm2 = vcmask 195584   ;;  %v1201_v47 = vmov 0   ;;  %s894_s25 = sshll.u32 %s1268_s9, 4  ;;  %s417_s22 = scalar_lea.vmem [#allocation10], %s1397_s19 }
  0x62   : > { %428 = vrot.lane.b32.xlu0 %v426_v3, %s1200_s23  ;;  %505 = vmatpush.msra.mxu1 %v423_v7  ;;  %v418_v10 = vld [vmem:[%s349_s26] sm:$0xff]  ;;  %v419_v11 = vld [vmem:[%s349_s26 + $0x8] sm:$0xff]  ;;  %s732_s20 = scalar_lea.hbm %s1509_s8, %s894_s25  ;;  %s734_s3 = sshll.u32 %s417_s22, 4  ;;  %s735_s3 = int_to_ptr.vmem [resolvable:$true] %s734_s3 }
  0x63   : > { %486 = vmatpush.msra.mxu0 %v420_v8  ;;  %v467_v41 = vld [vmem:[#allocation8 + $0x8] sm:$0xff]  ;;  %v668_v46 = vld [vmem:[%s1505_s4] sm:$0xff]  ;;  %997 = vset.pattern.permute.xlu0 %v1201_v47  ;;  %s736_s30 = sshll.u32 %s732_s20, 4  ;;  %s721_s9 = scalar_lea.sflag [#allocation4], %s1394_s18  ;;  %s737_s30 = int_to_ptr.hbm [resolvable:$true] %s736_s30 }
  0x64   : > { %506 = vmatpush.msra.mxu1 %v421_v9  ;;  %v465_v55 = vld [vmem:[#allocation8] sm:$0xff]  ;;  %s1134_s11 = sshra.s32 %s737_s30, 4  ;;  %s1140_s19 = scalar_lea.hbm %s1509_s8, 32  ;;  %s1135_s11 = int_to_ptr.hbm [resolvable:$true] %s1134_s11 }
  0x65   : > { %487 = vmatpush.msra.mxu0 %v418_v10  ;;  %s1136_s21 = scalar_lea.hbm %s1135_s11, 16  ;;  %p1141_p1 = scmp.lt.s32.totalorder %s1135_s11, %s1509_s8 }
  0x66   : > { %507 = vmatpush.msra.mxu1 %v419_v11  ;;  %880 = vmatmul.msk.f32.vlgmr.msra.gmra.mxu0 %vm468_vm2, %v467_v41  ;;  %p1137_p11 = scmp.ne.s32.totalorder %s1135_s11, %s1136_s21  ;;  %p1142_p2 = scmp.lt.s32.totalorder %s1140_s19, %s1136_s21 }
  0x67   : > { %881 = vmatmul.msk.f32.vlgmr.msra.gmra.mxu1 %vm468_vm2, %v467_v41 }
  0x68   : > { %p1138_p13 = pnand %p1137_p11, %p1286_p6  ;;  %p1143_p3 = por %p1142_p2, %p1141_p1 }
  0x69   : > { %451 = vrot.lane.b32.xlu1 %v448_v4, %s1199_s13 }
  0x6a   : > { %430 = vrot.lane.b32.xlu0 %v427_v5, %s1200_s23  ;;  %p1139_p9 = pneg %p1138_p13 }
  0x6c   : > { %p1144_p8 = pnand %p1143_p3, %p1139_p9 }
  0xd3   : > { %v450_v12 = vpop.permute.xlu1 %449 }
  0xd4   : > { %v429_v13 = vpop.permute.xlu0 %428  ;;  %v458_v25 = vmul.f32 %v450_v12, %v418_v10  ;;  %v461_v27 = vmul.f32 %v450_v12, %v420_v8  ;;  %v463_v35 = vmul.f32 %v450_v12, %v422_v6 }
  0xd5   : > { %v437_v19 = vmul.f32 0.0, %v429_v13 }
  0xdb   : > { %v452_v14 = vpop.permute.xlu1 %451 }
  0xdc   : > { %v431_v15 = vpop.permute.xlu0 %430  ;;  %v454_v20 = vsel %vm453_vm1, %v450_v12, %v452_v14  ;;  %v460_v34 = vmul.f32 0.0, %v452_v14 }
  0xdd   : > { %v441_v16 = vmul.f32 %v431_v15, %v421_v9  ;;  %v439_v17 = vmul.f32 %v431_v15, %v419_v11  ;;  %v433_v18 = vsel %vm432_vm0, %v429_v13, %v431_v15  ;;  %v462_v26 = vmul.f32 %v454_v20, %v421_v9 }
  0xde   : > { %v442_v21 = vmul.f32 %v433_v18, %v422_v6  ;;  %v438_v22 = vmul.f32 %v433_v18, %v418_v10  ;;  %v464_v28 = vmul.f32 %v454_v20, %v423_v7  ;;  %v443_v29 = vmul.f32 %v431_v15, %v423_v7 }
  0xdf   : > { %523 = vrot.lane.b32.xlu1 %v439_v17, %s1199_s13  ;;  %v440_v30 = vmul.f32 %v433_v18, %v420_v8  ;;  %v992_v31 = vpack.i.bf16 %v458_v25, %v462_v26  ;;  %v977_v36 = vpack.i.bf16 %v463_v35, %v460_v34  ;;  %v459_v37 = vmul.f32 %v454_v20, %v419_v11  ;;  %v589_v8 = vld [vmem:[#allocation8 + $0x10] sm:$0xff] }
  0xe0   : > { %v967_v23 = vpack.i.bf16 %v442_v21, %v437_v19  ;;  %v982_v24 = vpack.i.bf16 %v438_v22, %v441_v16  ;;  %v987_v33 = vpack.i.bf16 %v461_v27, %v464_v28 }
  0xe1   : > { %v972_v32 = vpack.i.bf16 %v440_v30, %v443_v29 }
  0xe2   : > { %968 = vrot.lane.b32.xlu2 %v967_v23, %s1199_s13  ;;  %983 = vrot.lane.b32.xlu0 %v982_v24, %s1199_s13 }
  0xe3   : > { %v489_v11 = vpop.f32.mrf.mxu0 }
  0xe4   : > { %v509_v12 = vpop.f32.mrf.mxu1 }
  0xe7   : > { %993 = vrot.lane.b32.xlu1 %v992_v31, %s1200_s23 }
  0xea   : > { %973 = vrot.lane.b32.xlu2 %v972_v32, %s1199_s13  ;;  %988 = vrot.lane.b32.xlu0 %v987_v33, %s1200_s23 }
  0xf2   : > { %978 = vrot.lane.b32.xlu2 %v977_v36, %s1200_s23  ;;  %671 = vperm.xlu0 %997, %v668_v46  }
  0xfa   : > { %599 = vrot.lane.b32.xlu2 %v459_v37, %s1200_s23 }
 0x13c   : > { %v969_v38 = vpop.permute.xlu2 %968 }
 0x13d   : > { %v971_v39 = vunpack.i.h.bf16 %v969_v38  ;;  %v970_v40 = vunpack.i.l.bf16 %v969_v38 }
 0x13f   : > { %v537_v42 = vsel %vm453_vm1, %v970_v40, %v971_v39 }
 0x140   : > { %561 = vmatpush.msra.mxu2 %v537_v42 }
 0x144   : > { %v974_v43 = vpop.permute.xlu2 %973 }
 0x145   : > { %v976_v44 = vunpack.i.h.bf16 %v974_v43  ;;  %v975_v45 = vunpack.i.l.bf16 %v974_v43 }
 0x147   : > { %v535_v48 = vsel %vm453_vm1, %v970_v40, %v976_v44  ;;  %v538_v49 = vsel %vm453_vm1, %v971_v39, %v975_v45 }
 0x148   : > { %562 = vmatpush.msra.mxu2 %v535_v48  ;;  %581 = vmatpush.msra.mxu3 %v538_v49 }
 0x14c   : > { %v979_v54 = vpop.permute.xlu2 %978 }
 0x14d   : > { %v981_v60 = vunpack.i.h.bf16 %v979_v54  ;;  %v980_v62 = vunpack.i.l.bf16 %v979_v54 }
 0x151   : > { %v524_v50 = vpop.permute.xlu1 %523 }
 0x154   : > { %v984_v51 = vpop.permute.xlu0 %983  ;;  %v600_v5 = vpop.permute.xlu2 %599 }
 0x155   : > { %v986_v52 = vunpack.i.h.bf16 %v984_v51  ;;  %v985_v53 = vunpack.i.l.bf16 %v984_v51  ;;  %v612_v10 = vsel %vm432_vm0, %v600_v5, %v980_v62 }
 0x157   : > { %v533_v56 = vsel %vm453_vm1, %v970_v40, %v986_v52  ;;  %v536_v57 = vsel %vm453_vm1, %v976_v44, %v985_v53  ;;  %v534_v58 = vsel %vm453_vm1, %v986_v52, %v524_v50  ;;  %v688_v40 = vld [vmem:[%s1506_s5] sm:$0xff] }
 0x158   : > { %563 = vmatpush.msra.mxu2 %v533_v56  ;;  %582 = vmatpush.msra.mxu3 %v536_v57  ;;  %v708_v44 = vld [vmem:[%s1507_s6] sm:$0xff] }
 0x159   : > { %882 = vmatmul.msk.f32.vlgmr.msra.gmra.mxu2 %vm468_vm2, %v465_v55  ;;  %v994_v59 = vpop.permute.xlu1 %993 }
 0x15a   : > { %583 = vmatpush.msra.mxu3 %v534_v58  ;;  %v995_v63 = vunpack.i.l.bf16 %v994_v59  ;;  %v996_v2 = vunpack.i.h.bf16 %v994_v59 }
 0x15b   : > { %883 = vmatmul.msk.f32.vlgmr.msra.gmra.mxu3 %vm468_vm2, %v465_v55 }
 0x15c   : > { %v989_v61 = vpop.permute.xlu0 %988  ;;  %v614_v7 = vsel %vm432_vm0, %v995_v63, %v980_v62  ;;  %v611_v9 = vsel %vm432_vm0, %v996_v2, %v600_v5 }
 0x15d   : > { %v991_v0 = vunpack.i.h.bf16 %v989_v61  ;;  %v990_v1 = vunpack.i.l.bf16 %v989_v61 }
 0x15f   : > { %v615_v3 = vsel %vm432_vm0, %v981_v60, %v990_v1  ;;  %v616_v4 = vsel %vm432_vm0, %v990_v1, %v980_v62  ;;  %v613_v6 = vsel %vm432_vm0, %v991_v0, %v995_v63 }
 0x160   : > { %639 = vmatpush.msrb.mxu0 %v615_v3  ;;  %659 = vmatpush.msrb.mxu1 %v616_v4 }
 0x162   : > { %640 = vmatpush.msrb.mxu0 %v613_v6  ;;  %660 = vmatpush.msrb.mxu1 %v614_v7 }
 0x164   : > { %641 = vmatpush.msrb.mxu0 %v611_v9  ;;  %661 = vmatpush.msrb.mxu1 %v612_v10  ;;  %v672_v17 = vpop.permute.xlu0 %671 }
 0x165   : > { %884 = vmatmul.msk.f32.vlgmr.msrb.gmra.mxu0 %vm468_vm2, %v589_v8  ;;  %885 = vmatmul.msk.f32.vlgmr.msrb.gmra.mxu1 %vm468_vm2, %v589_v8 }
 0x1dc   : > { %v565_v13 = vpop.f32.mrf.mxu2 }
 0x1dd   : > { %v566_v15 = vadd.f32 %v565_v13, %v489_v11 }
 0x1de   : > { %v585_v14 = vpop.f32.mrf.mxu3 }
 0x1df   : > { %v586_v16 = vadd.f32 %v585_v14, %v509_v12 }
 0x1e2   : > { %v643_v18 = vpop.f32.mrf.mxu0  ;;  %v663_v19 = vpop.f32.mrf.mxu1 }
 0x1e3   : > { %v666_v20 = vadd.f32 %v643_v18, %v566_v15  ;;  %v667_v21 = vadd.f32 %v663_v19, %v586_v16 }
 0x1e5   : > { %v674_v22 = vadd.f32 %v672_v17, %v666_v20  ;;  %v675_v23 = vadd.f32 %v672_v17, %v667_v21 }
 0x1e7   : > { %v676_v24 = vadd.f32 %v675_v23, %v674_v22 }
 0x1e9   : > { %677 = vadd.xlane.f32.xlu1 %v676_v24 }
 0x25c   : > { %v678_v25 = vpop.xlane.xlu1 %677 }
 0x25d   : > { %v679_v26 = vmul.f32 0.00390625, %v678_v25 }
 0x25f   : > { %v680_v27 = vsub.f32 %v674_v22, %v679_v26  ;;  %v681_v28 = vsub.f32 %v675_v23, %v679_v26 }
 0x261   : > { %v682_v29 = vmul.f32 %v680_v27, %v680_v27  ;;  %v683_v30 = vmul.f32 %v681_v28, %v681_v28 }
 0x263   : > { %v684_v31 = vadd.f32 %v683_v30, %v682_v29 }
 0x265   : > { %685 = vadd.xlane.f32.xlu2 %v684_v31 }
 0x2d8   : > { %v686_v32 = vpop.xlane.xlu2 %685 }
 0x2d9   : > { %v687_v33 = vmul.f32 0.00390625, %v686_v32 }
 0x2db   : > { %v689_v34 = vadd.f32 1e-05, %v687_v33 }
 0x2dd   : > { %998 = vrsqrt.f32 %v689_v34  ;;  %vm696_vm4 = vweird.f32 %v689_v34 }
 0x2e3   : > { %v999_v35 = vpop.eup %998 }
 0x2e4   : > { %v691_v36 = vmul.f32 %v999_v35, %v689_v34  ;;  %vm697_vm3 = vweird.f32 %v999_v35 }
 0x2e5   : > { %vm698_vm5 = vmor %vm696_vm4, %vm697_vm3 }
 0x2e6   : > { %v692_v37 = vmul.f32 %v999_v35, %v691_v36 }
 0x2e8   : > { %v693_v38 = vmul.f32 0.5, %v692_v37 }
 0x2ea   : > { %v694_v39 = vsub.f32 1.5, %v693_v38 }
 0x2ec   : > { %v695_v41 = vmul.f32 %v999_v35, %v694_v39 }
 0x2ee   : > { %v699_v42 = vsel %vm698_vm5, %v999_v35, %v695_v41 }
 0x2ef   : > { %v700_v43 = vmul.f32 %v699_v42, %v688_v40 }
 0x2f1   : > { %703 = vperm.xlu0 %997, %v700_v43  }
 0x2f9   : > { %711 = vperm.xlu0 %997, %v708_v44  }
 0x363   : > { %v704_v45 = vpop.permute.xlu0 %703 }
 0x364   : > { %v706_v46 = vmul.f32 %v704_v45, %v680_v27  ;;  %v707_v47 = vmul.f32 %v704_v45, %v681_v28 }
 0x36b   : > { %v712_v48 = vpop.permute.xlu0 %711 }
 0x36c   : > { %v714_v49 = vadd.f32 %v712_v48, %v706_v46  ;;  %v715_v50 = vadd.f32 %v712_v48, %v707_v47 }
 0x36e   : > { %v716_v51 = vmax.f32 %v714_v49, 0.0  ;;  %v717_v52 = vmax.f32 %v715_v50, 0.0 }
 0x370   : > { %718 = vst [vmem:[%s417_s22] sm:$0xff] %v716_v51 }
 0x371   : > { %719 = vst [vmem:[%s417_s22 + $0x8] sm:$0xff] %v717_v52 }
 0x372   : > { %1147 = shalt.err (!%p1144_p8)
}
 0x373   : > { %905 = dma.vmem_to_hbm [thread:$0]  (%p1286_p6), %s735_s3, 256, %s737_s30, %s721_s9  }
 0x374 PF: > { %s1535_s18 = sld [smem:[#allocation15_spill]] }
 0x375   : > { %s1537_s16 = sld [smem:[#allocation16_spill]] }
 0x37a   : > { %s748_s24 = sand.u32 1, %s1535_s18  }
 0x37b   : > { %p1538_p7 = scmp.ge.s32.totalorder %s1537_s16, 2  ;;  %s749_s1 = scalar_lea.sflag [#allocation4], %s748_s24 }
 0x37d   : > { %p922_p12 = pnand %p1538_p7, %p1295_p10 }
 0x37f   : > { %p923_p0 = pneg %p922_p12 }
 0x381   : > { %1177 = dma.done.wait (%p923_p0), %s749_s1, 256  }
 0x382   : > { %1179 = vsyncadd (%p923_p0), %s749_s1, 4294967040  ;;  %s1539_s30 = sld [smem:[#allocation17_spill]]  ;;  %s1541_s27 = smov %s1186_s28 }
 0x383   : > { %s1540_s17 = sld [smem:[#allocation18_spill]]  ;;  %s1542_s28 = smov %s1190_s29 }
 0x388   : > { %p25_p4 = scmp.ge.s32.totalorder %s1539_s30, 4  }
 0x389   : > { %s1543_s29 = smov %s1540_s17 }
 0x38a   :  { %27 = sbr.rel (!%p25_p4) target bundleno = 11 (0xb), region = 128 }
 0x38f   :  { %755 = vsyncpa [#allocation3], 1 }
 0x390   :  { %757 = vsyncpa [#allocation3 + $0x1], 1 }
 0x391   :  { %758 = vsyncpa [#allocation6], 1 }
 0x392   :  { %760 = vsyncpa [#allocation6 + $0x1], 1 }
 0x393   :  { %761 = vsyncpa [#allocation9], 1 }
 0x394   :  { %762 = vsyncpa [#allocation4], 1 }
 0x395   :  { %764 = vsyncpa [#allocation4 + $0x1], 1 }

</bundles_post_ra>
